<compile_context>
chip_gen: v7x
topology: tpu7x:2x2x1
jax: 0.10.0
libtpu: 0.0.40
codegen_flags: <defaults>
</compile_context>

<pallas_src>
import jax
import jax.numpy as jnp
from jax.experimental import pallas as pl
from jax.experimental.pallas import tpu as pltpu


def _chomp_copy_kernel(x_ref, o_ref):
    # Tiled path: input and output use the same (row_tile, lane_tile) window
    # over the kept region, so the body is a straight VMEM copy.  Ragged
    # row/lane tiles are masked by Pallas on the output store; the chomped
    # tail of x is only touched by masked-away lanes of the last lane tile.
    o_ref[...] = x_ref[...]


def _chomp_slice_kernel(x_ref, o_ref):
    # Short-length fallback: input block (row_tile, L), output block
    # (row_tile, L_out); slice the chomped tail off in VMEM.
    o_ref[...] = x_ref[:, : o_ref.shape[-1]]


def _sublane_multiple(dtype) -> int:
    # Sub-32-bit dtypes pack along sublanes; keep row tiles aligned to the
    # packed-row granularity (8 for f32, 16 for bf16, 32 for int8).
    bits = jnp.dtype(dtype).itemsize * 8
    return max(8, (32 // bits) * 8)


def _pick_row_tile(total_rows: int, rows_wanted: int, sub: int) -> int:
    # Largest row tile that is either a multiple of `sub` (>= 8) or equal to
    # total_rows; both satisfy the (8, 128) sublane rule.
    if rows_wanted >= total_rows or total_rows <= sub:
        return int(total_rows)
    rt = (rows_wanted // sub) * sub
    return int(max(sub, min(rt, total_rows)))


def _physical_vmem_bytes() -> int:
    try:
        return int(pltpu.get_tpu_info().vmem_capacity_bytes)
    except Exception:
        return 64 << 20  # v7x per-TC physical VMEM: the smallest current part.


def chomp1d(
    x: jax.Array,
    chomp_size: int,
    *,
    lane_tile: int = 1024,
    block_bytes: int | None = None,
    vmem_limit_bytes: int | None = None,
    input_buffer_count: int | None = None,
) -> jax.Array:
    """Pallas TPU equivalent of Chomp1d.forward: x[:, :, :-chomp_size]."""
    n, c, l = x.shape
    assert 0 <= chomp_size < l, "chomp_size must be in [0, L)"
    l_out = l - chomp_size

    if chomp_size == 0:
        # PyTorch's x[:, :, :-0] is an EMPTY tensor; match literal semantics.
        return x[:, :, :0]

    dt = jnp.dtype(x.dtype)
    itemsize = dt.itemsize
    sub = _sublane_multiple(dt)

    # (N, C, L) -> (N*C, L): free contiguous flatten; the chomp only touches
    # the last axis so it is preserved exactly by this reshape.
    r = n * c
    x2 = x.reshape(r, l)

    # ---- Generation-aware sizing (v5e/v6e: 128 MiB VMEM, v7x: 64 MiB). ----
    phys_vmem = _physical_vmem_bytes()
    if block_bytes is None:
        # ~1-4 MiB blocks; keep 2 buffers x (in + out) well under scoped VMEM.
        block_bytes = int(min(4 << 20, max(512 << 10, phys_vmem // 16)))
    if vmem_limit_bytes is None:
        vmem_limit_bytes = int(min(phys_vmem // 2, max(32 << 20, 8 * block_bytes)))

    out2_shape = jax.ShapeDtypeStruct((r, l_out), x.dtype)
    # Pure-bandwidth op: read the kept region once, write it back out once.
    cost = pl.CostEstimate(
        flops=0,
        transcendentals=0,
        bytes_accessed=2 * r * l_out * itemsize,
    )

    # ---- Short-length fallback (L_out < 128): full lane dims, tiled rows. --
    # Block last dims equal the full array dims, so the (8, 128) rule is
    # satisfied for any L / L_out; rows are tiled so large-C shapes still fit
    # the scoped VMEM limit.
    if l_out < 128:
        rows_wanted = max(1, block_bytes // max(1, l * itemsize))
        rt = _pick_row_tile(r, rows_wanted, sub)
        y2 = pl.pallas_call(
            _chomp_slice_kernel,
            out_shape=out2_shape,
            grid_spec=pltpu.PrefetchScalarGridSpec(
                num_scalar_prefetch=0,
                grid=(pl.cdiv(r, rt),),
                in_specs=[pl.BlockSpec((rt, l), lambda ri: (ri, 0))],
                out_specs=pl.BlockSpec((rt, l_out), lambda ri: (ri, 0)),
            ),
            compiler_params=pltpu.CompilerParams(
                dimension_semantics=("parallel",),
                vmem_limit_bytes=vmem_limit_bytes,
            ),
            cost_estimate=cost,
        )(x2)
        return y2.reshape(n, c, l_out)

    # ---- Main tiled path: 2-D (row_tile, lane_tile) blocks. ----------------
    # Lane tile: multiple of 128 (unmasked, lane-dense vst on non-ragged
    # tiles), never wider than the kept length rounded up to 128.
    lt_cap = pl.cdiv(l_out, 128) * 128
    lt = int(min(max(128, (lane_tile // 128) * 128), lt_cap))

    # Row tile: fill the block-byte budget; if all rows fit in one tile and
    # budget remains, widen the lane tile instead (fewer, bigger grid steps).
    rows_wanted = max(1, block_bytes // (lt * itemsize))
    rt = _pick_row_tile(r, rows_wanted, sub)
    if rt == r:
        lt_more = (block_bytes // (rt * itemsize) // 128) * 128
        lt = int(min(max(lt, lt_more), lt_cap))

    # Identical windows on input and output: for every kept index k < L_out,
    # y2[row, k] == x2[row, k]; the chomped tail is never stored.
    in_spec = pl.BlockSpec((rt, lt), lambda ri, lj: (ri, lj))
    if input_buffer_count is not None and input_buffer_count != 2:
        # Optional deeper input pipelining (e.g. 3 on 128 MiB v5e/v6e parts).
        try:
            in_spec = pl.BlockSpec(
                (rt, lt), lambda ri, lj: (ri, lj),
                pipeline_mode=pl.Buffered(int(input_buffer_count)),
            )
        except TypeError:
            pass  # older JAX without pipeline_mode: keep default 2 buffers.
    out_spec = pl.BlockSpec((rt, lt), lambda ri, lj: (ri, lj))

    # Rows split before lanes; both axes "parallel" so the grid can be
    # sharded across TensorCores (v7x megacore) for this bandwidth copy.
    grid = (pl.cdiv(r, rt), pl.cdiv(l_out, lt))

    y2 = pl.pallas_call(
        _chomp_copy_kernel,
        out_shape=out2_shape,
        grid_spec=pltpu.PrefetchScalarGridSpec(
            num_scalar_prefetch=0,
            grid=grid,
            in_specs=[in_spec],
            out_specs=out_spec,
        ),
        compiler_params=pltpu.CompilerParams(
            dimension_semantics=("parallel", "parallel"),
            vmem_limit_bytes=vmem_limit_bytes,
        ),
        cost_estimate=cost,
    )(x2)
    return y2.reshape(n, c, l_out)


if __name__ == "__main__":
    key0, key1, key2 = jax.random.split(jax.random.PRNGKey(0), 3)

    # 1) Primary small-shape check (matches the module's toy usage):
    #    L_out < 128 -> short-length fallback path.
    N, C, L = 2, 4, 16
    chomp_size = 3
    x = jax.random.normal(key0, (N, C, L), dtype=jnp.float32)
    y = chomp1d(x, chomp_size)
    jax.block_until_ready(y)
    assert y.shape == (N, C, L - chomp_size)
    assert y.dtype == x.dtype
    assert jnp.array_equal(y, x[:, :, :-chomp_size])

    # 2) Tiled path with a ragged last lane tile + partial input-block read
    #    (L_out = 640, lane tile 512 -> tiles [0,512) and [512,1024) masked).
    N2, C2, L2, chomp2 = 2, 8, 643, 3
    x2 = jax.random.normal(key1, (N2, C2, L2), dtype=jnp.float32)
    y2 = chomp1d(x2, chomp2, lane_tile=512, block_bytes=32 * 1024)
    jax.block_until_ready(y2)
    assert jnp.array_equal(y2, x2[:, :, :-chomp2])

    # 3) Tiled path with a row split + ragged last row tile (48 rows, tile 32).
    N3, C3, L3, chomp3 = 1, 48, 515, 3
    x3 = jax.random.normal(key2, (N3, C3, L3), dtype=jnp.float32)
    y3 = chomp1d(x3, chomp3, block_bytes=64 * 1024)
    jax.block_until_ready(y3)
    assert jnp.array_equal(y3, x3[:, :, :-chomp3])

    # 4) Literal PyTorch parity for chomp_size == 0 (empty result).
    y0 = chomp1d(x, 0)
    jax.block_until_ready(y0)
    assert y0.shape == (N, C, 0)

    print("KERNEL_OK")
</pallas_src>

<mosaic_0001>
module attributes {stable_mosaic.version = 11 : i64} {
  func.func @_chomp_slice_kernel(%arg0: i32, %arg1: memref<8x16xf32, #tpu.memory_space<vmem>>, %arg2: memref<8x13xf32, #tpu.memory_space<vmem>>) attributes {dimension_semantics = [#tpu.dimension_semantics<parallel>], iteration_bounds = array<i64: 1>, scalar_prefetch = 0 : i64, scratch_operands = 0 : i64, tpu.core_type = #tpu.core_type<tc>, window_params = [{transform_indices = @transform_0, window_bounds = array<i64: 8, 16>}, {transform_indices = @transform_1, window_bounds = array<i64: 8, 13>}]} {
    %c0 = arith.constant 0 : index
    %c0_0 = arith.constant 0 : index
    %0 = vector.load %arg1[%c0, %c0_0] : memref<8x16xf32, #tpu.memory_space<vmem>>, vector<8x13xf32>
    %c0_1 = arith.constant 0 : index
    %c0_2 = arith.constant 0 : index
    %1 = vector.load %arg2[%c0_1, %c0_2] : memref<8x13xf32, #tpu.memory_space<vmem>>, vector<8x13xf32>
    tpu.vector_store %arg2[%c0_1, %c0_2], %0 {strides = array<i32>} : memref<8x13xf32, #tpu.memory_space<vmem>>, vector<8x13xf32>,
    return
  }
  func.func @transform_0(%arg0: i32) -> (i32, i32) {
    %c0_i32 = arith.constant 0 : i32
    %c0_i32_0 = arith.constant 0 : i32
    return %arg0, %c0_i32 : i32, i32
  }
  func.func @transform_1(%arg0: i32) -> (i32, i32) {
    %c0_i32 = arith.constant 0 : i32
    %c0_i32_0 = arith.constant 0 : i32
    return %arg0, %c0_i32 : i32, i32
  }
}

</mosaic_0001>

<bundles_post_ra>
// kernel: tpu_custom_call.1
= control target key start
LH: loop header
LB: loop body
LE: loop exit
PB: predicated region body
PF: predicated region fallthrough
CT: control target
= control target key end

     0   :  { %6 = vsyncpa [#allocation3], 0  ;;  %s125_s0 = inlined_call_operand.hbm [shape: f32[8,16], index: 0, kind: input, shape index: {}]   ;;  %s126_s1 = inlined_call_operand.hbm [shape: f32[8,13], index: 1, kind: output, shape index: {}]  }
   0x1   :  { %7 = vsyncpa [#allocation4], 0  ;;  %s89_s6 = smov [#allocation2]   ;;  %s41_s10 = scalar_lea.hbm %s125_s0, 128 }
   0x2   :  { %s14_s7 = sshll.u32 %s89_s6, 4  ;;  %p42_p0 = scmp.ne.s32.totalorder %s125_s0, %s41_s10  ;;  %s15_s7 = int_to_ptr.vmem [resolvable:$true] %s14_s7 }
   0x3   :  { %p45_p1 = scmp.lt.u32.totalorder %s41_s10, %s125_s0 }
   0x5   :  { %p47_p2 = pnand %p45_p1, %p42_p0 }
   0x7   :  { %50 = shalt.err (!%p47_p2)
}
   0x8   :  { %s51_s15 = scalar_lea.vmem %s15_s7, 128  ;;  %p56_p4 = scmp.lt.s32.totalorder %s15_s7, %s15_s7 }
   0x9   :  { %p52_p3 = scmp.ne.s32.totalorder %s15_s7, %s51_s15  ;;  %p57_p5 = scmp.lt.s32.totalorder %s51_s15, %s51_s15 }
   0xb   :  { %p58_p6 = por %p57_p5, %p56_p4 }
   0xd   :  { %p59_p7 = pnand %p58_p6, %p52_p3 }
   0xf   :  { %62 = shalt.err (!%p59_p7)
}
  0x10   :  { %17 = dma.hbm_to_vmem [thread:$0]  %s125_s0, 128, %s15_s7, [#allocation3]  }
  0x11   :  { %85 = dma.done.wait [#allocation3], 128  }
  0x12   :  { %86 = vsyncadd [#allocation3], 4294967168  ;;  %s90_s18 = smov [#allocation5]   ;;  %vm22_vm0 = vcmask 105472   ;;  %v21_v0 = vld [vmem:[#allocation2] sm:$0xff] }
  0x13   :  { %s30_s19 = sshll.u32 %s90_s18, 4  ;;  %23 = vst.msk [vmem:[#allocation5] sm:$0xff] %vm22_vm0, %v21_v0  ;;  %s31_s19 = int_to_ptr.vmem [resolvable:$true] %s30_s19 }
  0x14   :  { %s63_s20 = scalar_lea.vmem %s31_s19, 128  ;;  %p68_p9 = scmp.lt.s32.totalorder %s31_s19, %s31_s19 }
  0x15   :  { %p64_p8 = scmp.ne.s32.totalorder %s31_s19, %s63_s20  ;;  %p69_p10 = scmp.lt.s32.totalorder %s63_s20, %s63_s20 }
  0x17   :  { %p70_p11 = por %p69_p10, %p68_p9 }
  0x19   :  { %p71_p12 = pnand %p70_p11, %p64_p8 }
  0x1b   :  { %74 = shalt.err (!%p71_p12)
}
  0x1c   :  { %s75_s23 = scalar_lea.hbm %s126_s1, 128 }
  0x1d   :  { %p76_p13 = scmp.ne.s32.totalorder %s126_s1, %s75_s23  ;;  %p79_p0 = scmp.lt.u32.totalorder %s75_s23, %s126_s1 }
  0x1f   :  { %p81_p1 = pnand %p79_p0, %p76_p13 }
  0x21   :  { %84 = shalt.err (!%p81_p1)
}
  0x22   :  { %33 = dma.vmem_to_hbm [thread:$0]  %s31_s19, 128, %s126_s1, [#allocation4]  }
  0x23   :  { %87 = dma.done.wait [#allocation4], 128  }
  0x24   :  { %88 = vsyncadd [#allocation4], 4294967168 }
  0x25   :  { %37 = vsyncpa [#allocation3], 1 }
  0x26   :  { %38 = vsyncpa [#allocation4], 1 }

</bundles_post_ra>
